<compile_context>
chip_gen: v7x
topology: tpu7x:2x2x1
jax: 0.10.0
libtpu: 0.0.40
codegen_flags: <defaults>
</compile_context>

<pallas_src>
import functools

import jax
import jax.numpy as jnp
from jax.experimental import pallas as pl
from jax.experimental.pallas import tpu as pltpu


def _round_up(x, m):
    return ((x + m - 1) // m) * m


# ---------------------------------------------------------------------------
# Fused kernel: GAP (spatially tiled, accumulated) -> proj -> standardize ->
# final linear.  Grid = (batch tiles, hw tiles); hw is the reduction axis.
# ---------------------------------------------------------------------------
def _lfcbm_kernel(x_ref, wc_ref, mean_ref, invstd_ref, wg_ref, bg_ref,
                  logits_ref, projc_ref, feats_acc, *, hw, hw_tile):
    s = pl.program_id(1)

    @pl.when(s == 0)
    def _init():
        feats_acc[...] = jnp.zeros_like(feats_acc)

    # Partial spatial sum for this hw slab (upcast to f32 for accumulation).
    xblk = x_ref[...].astype(jnp.float32)                    # (TN, C, HWt)
    if hw % hw_tile != 0:
        # Ragged last hw block: zero out-of-range lanes so they don't pollute
        # the GAP sum.
        lane = jax.lax.broadcasted_iota(jnp.int32, xblk.shape, 2)
        xblk = jnp.where(s * hw_tile + lane < hw, xblk, 0.0)
    feats_acc[...] += jnp.sum(xblk, axis=-1)                  # (TN, C)

    @pl.when(s == pl.num_programs(1) - 1)
    def _finalize():
        # wc_ref already carries the 1/HW GAP factor (folded in the wrapper),
        # so feats_acc holds sums, not means.  bf16 MXU inputs, f32 accum.
        proj = jnp.dot(feats_acc[...].astype(jnp.bfloat16), wc_ref[...],
                       preferred_element_type=jnp.float32)    # (TN, Kp)
        # Standardize on the VPU (inv_std precomputed; no in-kernel divide).
        projc_ref[...] = ((proj - mean_ref[...]) * invstd_ref[...]
                          ).astype(projc_ref.dtype)
        # Final linear; feed from projc_ref so `proj` dies before this dot.
        logits = jnp.dot(projc_ref[...].astype(jnp.bfloat16), wg_ref[...],
                         preferred_element_type=jnp.float32)  # (TN, Mp)
        logits_ref[...] = logits + bg_ref[...]


def lfcbm_forward(x_nchw, W_c, W_g, b_g, proj_mean, proj_std,
                  projc_dtype=jnp.float32):
    n, c, h, w = x_nchw.shape
    hw = h * w
    k, d = W_c.shape            # num concepts, feature dim
    m = W_g.shape[0]            # num classes
    assert d == c, "GAP backbone stand-in produces C features per image"

    # Lane-dense padding of concept / class axes (multiples of 128).
    kp = _round_up(k, 128)
    mp = _round_up(m, 128)

    # --- one-time wrapper-side parameter prep -------------------------------
    # Padding invariant (do not change): padded concept lanes have wc=0,
    # mean=0, invstd=0 and padded rows of wg=0, so padded concepts contribute
    # exactly 0 to proj_c and logits; padded class lanes get bg=0.
    wc_t = jnp.zeros((d, kp), jnp.bfloat16).at[:, :k].set(
        (W_c.T / hw).astype(jnp.bfloat16))                    # 1/HW folded in
    wg_t = jnp.zeros((kp, mp), jnp.bfloat16).at[:k, :m].set(
        W_g.T.astype(jnp.bfloat16))
    mean2 = jnp.zeros((1, kp), jnp.float32).at[0, :k].set(
        proj_mean.astype(jnp.float32))
    invstd2 = jnp.zeros((1, kp), jnp.float32).at[0, :k].set(
        (1.0 / proj_std).astype(jnp.float32))
    bg2 = jnp.zeros((1, mp), jnp.float32).at[0, :m].set(
        b_g.astype(jnp.float32))

    # x streamed in its native dtype; reshape is a free view (no pad, no cast).
    x3d = x_nchw.reshape(n, c, hw)
    x_itemsize = jnp.dtype(x3d.dtype).itemsize
    pc_itemsize = jnp.dtype(projc_dtype).itemsize

    # --- VMEM budget & tile selection ---------------------------------------
    try:
        vmem_cap = int(pltpu.get_tpu_info().vmem_capacity_bytes)
    except Exception:
        vmem_cap = 64 << 20            # conservative (v7x per-TensorCore)
    vmem_budget = int(min((vmem_cap * 7) // 8, 100 << 20))

    weight_bytes = (d * kp + kp * mp) * 2 + (2 * kp + mp) * 4   # single-buffer

    def step_bytes(tn, hw_t):
        return (weight_bytes
                + 2 * tn * c * hw_t * x_itemsize     # x block (double-buffered)
                + 2 * tn * mp * 4                    # logits block (dbuf)
                + 2 * tn * kp * pc_itemsize          # proj_c block (dbuf)
                + tn * max(c, 128) * 4)              # feats accumulator scratch

    # Grid-aware cap: keep >= ~4 batch steps so the DMA pipeline has depth and
    # both v7x TensorCores get work; never below the 8-sublane minimum.
    tile_cap = min(256, max(8, _round_up(pl.cdiv(n, 4), 8)))
    tn_cands = sorted({8, 16, 32, 64, 128, 256, tile_cap}, reverse=True)
    if hw <= 128:
        hw_cands = [hw]                                    # single hw step
    else:
        hw_cands = [t for t in (2048, 1024, 512, 256, 128)
                    if t <= max(128, hw // 2)]             # >=2 hw steps

    def _pick_tiles():
        for tn in tn_cands:
            if tn > tile_cap:
                continue
            for hw_t in hw_cands:
                if step_bytes(tn, hw_t) <= vmem_budget:
                    return tn, hw_t
        return 8, hw_cands[-1]

    tile_n, hw_tile = _pick_tiles()
    grid = (pl.cdiv(n, tile_n), pl.cdiv(hw, hw_tile))

    kernel = functools.partial(_lfcbm_kernel, hw=hw, hw_tile=hw_tile)

    cost = pl.CostEstimate(
        flops=2 * n * d * kp + 2 * n * kp * mp + n * c * hw,
        transcendentals=0,
        bytes_accessed=(x3d.size * x_itemsize + weight_bytes
                        + n * (kp * pc_itemsize + mp * 4)),
    )

    out_shape = (
        jax.ShapeDtypeStruct((n, mp), jnp.float32),   # logits
        jax.ShapeDtypeStruct((n, kp), projc_dtype),   # proj_c (concepts)
    )

    def _call(weight_pipeline_mode):
        wkw = ({} if weight_pipeline_mode is None
               else {"pipeline_mode": weight_pipeline_mode})
        in_specs = [
            # x: tiled over batch and spatial -> pipelined DMA per grid step.
            pl.BlockSpec((tile_n, c, hw_tile), lambda i, s: (i, 0, s)),
            # Grid-invariant operands: constant block index -> stay resident.
            pl.BlockSpec((d, kp), lambda i, s: (0, 0), **wkw),
            pl.BlockSpec((1, kp), lambda i, s: (0, 0), **wkw),
            pl.BlockSpec((1, kp), lambda i, s: (0, 0), **wkw),
            pl.BlockSpec((kp, mp), lambda i, s: (0, 0), **wkw),
            pl.BlockSpec((1, mp), lambda i, s: (0, 0), **wkw),
        ]
        out_specs = (
            pl.BlockSpec((tile_n, mp), lambda i, s: (i, 0)),
            pl.BlockSpec((tile_n, kp), lambda i, s: (i, 0)),
        )
        fn = pl.pallas_call(
            kernel,
            out_shape=out_shape,
            grid=grid,
            in_specs=in_specs,
            out_specs=out_specs,
            scratch_shapes=[pltpu.VMEM((tile_n, c), jnp.float32)],
            compiler_params=pltpu.CompilerParams(
                dimension_semantics=("parallel", "arbitrary"),
                vmem_limit_bytes=vmem_budget),
            cost_estimate=cost,
        )
        return fn(x3d, wc_t, mean2, invstd2, wg_t, bg2)

    try:
        # Single-buffer the five grid-invariant operands (halves resident
        # weight VMEM vs the default double-buffering).
        logits_p, projc_p = _call(pl.Buffered(1))
    except Exception:
        # TODO(synk): pipeline_mode=pl.Buffered(1) unsupported on this jax
        # version; fall back to default (double-buffered) weight blocks.
        logits_p, projc_p = _call(None)

    # Slice off concept/class lane padding (batch is never padded: ragged last
    # blocks' garbage rows are dropped here / by OOB-write semantics).
    return logits_p[:n, :m], projc_p[:n, :k]


if __name__ == "__main__":
    key = jax.random.PRNGKey(0)
    k_x, k_wc, k_wg, k_bg, k_mu, k_sd = jax.random.split(key, 6)

    # Small shapes consistent with the forward pass.
    N, C, H, W = 2, 4, 16, 16     # input image batch (NCHW)
    D = C                         # backbone feature dim after GAP + flatten
    K = 32                        # number of concepts (W_c rows)
    M = 10                        # number of classes  (W_g rows)

    x = jax.random.normal(k_x, (N, C, H, W), dtype=jnp.float32)
    W_c = jax.random.normal(k_wc, (K, D), dtype=jnp.float32) * 0.1
    W_g = jax.random.normal(k_wg, (M, K), dtype=jnp.float32) * 0.1
    b_g = jax.random.normal(k_bg, (M,), dtype=jnp.float32) * 0.01
    proj_mean = jax.random.normal(k_mu, (K,), dtype=jnp.float32) * 0.1
    proj_std = jax.random.uniform(k_sd, (K,), dtype=jnp.float32,
                                  minval=0.5, maxval=1.5)

    logits, proj_c = lfcbm_forward(x, W_c, W_g, b_g, proj_mean, proj_std)
    jax.block_until_ready((logits, proj_c))

    # Pure-JAX reference (same math, f32, no Pallas).
    feats_ref = jnp.mean(x, axis=(2, 3))
    proj_ref = feats_ref @ W_c.T
    proj_c_ref = (proj_ref - proj_mean) / proj_std
    logits_ref = proj_c_ref @ W_g.T + b_g
    # Matmuls use bf16 MXU inputs -> relaxed tolerance vs the f32 reference.
    assert jnp.allclose(proj_c, proj_c_ref, atol=1e-2, rtol=1e-2)
    assert jnp.allclose(logits, logits_ref, atol=1e-2, rtol=1e-2)

    print("KERNEL_OK")
</pallas_src>

<mosaic_0001>
module attributes {stable_mosaic.version = 11 : i64} {
  func.func @_lfcbm_kernel(%arg0: i32, %arg1: i32, %arg2: memref<8x4x128xf32, #tpu.memory_space<vmem>>, %arg3: memref<4x128xbf16, #tpu.memory_space<vmem>>, %arg4: memref<1x128xf32, #tpu.memory_space<vmem>>, %arg5: memref<1x128xf32, #tpu.memory_space<vmem>>, %arg6: memref<128x128xbf16, #tpu.memory_space<vmem>>, %arg7: memref<1x128xf32, #tpu.memory_space<vmem>>, %arg8: memref<8x128xf32, #tpu.memory_space<vmem>>, %arg9: memref<8x128xf32, #tpu.memory_space<vmem>>, %arg10: memref<8x4xf32, #tpu.memory_space<vmem>>) attributes {dimension_semantics = [#tpu.dimension_semantics<parallel>, #tpu.dimension_semantics<arbitrary>], iteration_bounds = array<i64: 1, 2>, scalar_prefetch = 0 : i64, scratch_operands = 1 : i64, tpu.core_type = #tpu.core_type<tc>, window_params = [{transform_indices = @transform_0, window_bounds = array<i64: 8, 4, 128>}, {pipeline_mode = #tpu.pipeline_mode<synchronous>, transform_indices = @transform_1, window_bounds = array<i64: 4, 128>}, {pipeline_mode = #tpu.pipeline_mode<synchronous>, transform_indices = @transform_2, window_bounds = array<i64: 1, 128>}, {pipeline_mode = #tpu.pipeline_mode<synchronous>, transform_indices = @transform_3, window_bounds = array<i64: 1, 128>}, {pipeline_mode = #tpu.pipeline_mode<synchronous>, transform_indices = @transform_4, window_bounds = array<i64: 128, 128>}, {pipeline_mode = #tpu.pipeline_mode<synchronous>, transform_indices = @transform_5, window_bounds = array<i64: 1, 128>}, {transform_indices = @transform_6, window_bounds = array<i64: 8, 128>}, {transform_indices = @transform_7, window_bounds = array<i64: 8, 128>}]} {
    %c0_i32 = arith.constant 0 : i32
    %0 = arith.cmpi eq, %arg1, %c0_i32 : i32
    %1 = arith.extui %0 : i1 to i32
    %c0_i32_0 = arith.constant 0 : i32
    %2 = arith.cmpi ne, %1, %c0_i32_0 : i32
    scf.if %2 {
      %cst_8 = arith.constant 0.000000e+00 : f32
      %11 = vector.broadcast %cst_8 : f32 to vector<8x4xf32>
      %c0_9 = arith.constant 0 : index
      %c0_10 = arith.constant 0 : index
      %12 = vector.load %arg10[%c0_9, %c0_10] : memref<8x4xf32, #tpu.memory_space<vmem>>, vector<8x4xf32>
      tpu.vector_store %arg10[%c0_9, %c0_10], %11 {strides = array<i32>} : memref<8x4xf32, #tpu.memory_space<vmem>>, vector<8x4xf32>,
    } else {
    }
    %c0 = arith.constant 0 : index
    %c0_1 = arith.constant 0 : index
    %c0_2 = arith.constant 0 : index
    %3 = vector.load %arg2[%c0, %c0_1, %c0_2] : memref<8x4x128xf32, #tpu.memory_space<vmem>>, vector<8x4x128xf32>
    %c0_3 = arith.constant 0 : index
    %c0_4 = arith.constant 0 : index
    %4 = vector.load %arg10[%c0_3, %c0_4] : memref<8x4xf32, #tpu.memory_space<vmem>>, vector<8x4xf32>
    %cst = arith.constant dense<0.000000e+00> : vector<8x4xf32>
    %5 = vector.multi_reduction <add>, %3, %cst [2] : vector<8x4x128xf32> to vector<8x4xf32>
    %6 = arith.addf %4, %5 : vector<8x4xf32>
    %c0_5 = arith.constant 0 : index
    %c0_6 = arith.constant 0 : index
    %7 = vector.load %arg10[%c0_5, %c0_6] : memref<8x4xf32, #tpu.memory_space<vmem>>, vector<8x4xf32>
    tpu.vector_store %arg10[%c0_5, %c0_6], %6 {strides = array<i32>} : memref<8x4xf32, #tpu.memory_space<vmem>>, vector<8x4xf32>,
    %c1_i32 = arith.constant 1 : i32
    %8 = arith.cmpi eq, %arg1, %c1_i32 : i32
    %9 = arith.extui %8 : i1 to i32
    %c0_i32_7 = arith.constant 0 : i32
    %10 = arith.cmpi ne, %9, %c0_i32_7 : i32
    scf.if %10 {
      %c0_8 = arith.constant 0 : index
      %c0_9 = arith.constant 0 : index
      %11 = vector.load %arg10[%c0_8, %c0_9] : memref<8x4xf32, #tpu.memory_space<vmem>>, vector<8x4xf32>
      %12 = arith.truncf %11 : vector<8x4xf32> to vector<8x4xbf16>
      %c0_10 = arith.constant 0 : index
      %c0_11 = arith.constant 0 : index
      %13 = vector.load %arg3[%c0_10, %c0_11] : memref<4x128xbf16, #tpu.memory_space<vmem>>, vector<4x128xbf16>
      %cst_12 = arith.constant dense<0.000000e+00> : vector<8x128xf32>
      %14 = tpu.matmul %12, %13, %cst_12 {dimension_numbers = #tpu.dot_dimension_numbers<[1], [0], [0], [1], [0, 0, 1, 1], [], []>} : vector<8x4xbf16>, vector<4x128xbf16>, vector<8x128xf32> -> vector<8x128xf32>
      %c0_13 = arith.constant 0 : index
      %c0_14 = arith.constant 0 : index
      %15 = vector.load %arg4[%c0_13, %c0_14] : memref<1x128xf32, #tpu.memory_space<vmem>>, vector<1x128xf32>
      %16 = vector.broadcast %15 : vector<1x128xf32> to vector<8x128xf32>
      %17 = arith.subf %14, %16 : vector<8x128xf32>
      %c0_15 = arith.constant 0 : index
      %c0_16 = arith.constant 0 : index
      %18 = vector.load %arg5[%c0_15, %c0_16] : memref<1x128xf32, #tpu.memory_space<vmem>>, vector<1x128xf32>
      %19 = vector.broadcast %18 : vector<1x128xf32> to vector<8x128xf32>
      %20 = arith.mulf %17, %19 : vector<8x128xf32>
      %c0_17 = arith.constant 0 : index
      %c0_18 = arith.constant 0 : index
      %21 = vector.load %arg9[%c0_17, %c0_18] : memref<8x128xf32, #tpu.memory_space<vmem>>, vector<8x128xf32>
      tpu.vector_store %arg9[%c0_17, %c0_18], %20 {strides = array<i32>} : memref<8x128xf32, #tpu.memory_space<vmem>>, vector<8x128xf32>,
      %c0_19 = arith.constant 0 : index
      %c0_20 = arith.constant 0 : index
      %22 = vector.load %arg9[%c0_19, %c0_20] : memref<8x128xf32, #tpu.memory_space<vmem>>, vector<8x128xf32>
      %23 = arith.truncf %22 : vector<8x128xf32> to vector<8x128xbf16>
      %c0_21 = arith.constant 0 : index
      %c0_22 = arith.constant 0 : index
      %24 = vector.load %arg6[%c0_21, %c0_22] : memref<128x128xbf16, #tpu.memory_space<vmem>>, vector<128x128xbf16>
      %cst_23 = arith.constant dense<0.000000e+00> : vector<8x128xf32>
      %25 = tpu.matmul %23, %24, %cst_23 {dimension_numbers = #tpu.dot_dimension_numbers<[1], [0], [0], [1], [0, 0, 1, 1], [], []>} : vector<8x128xbf16>, vector<128x128xbf16>, vector<8x128xf32> -> vector<8x128xf32>
      %c0_24 = arith.constant 0 : index
      %c0_25 = arith.constant 0 : index
      %26 = vector.load %arg7[%c0_24, %c0_25] : memref<1x128xf32, #tpu.memory_space<vmem>>, vector<1x128xf32>
      %27 = vector.broadcast %26 : vector<1x128xf32> to vector<8x128xf32>
      %28 = arith.addf %25, %27 : vector<8x128xf32>
      %c0_26 = arith.constant 0 : index
      %c0_27 = arith.constant 0 : index
      %29 = vector.load %arg8[%c0_26, %c0_27] : memref<8x128xf32, #tpu.memory_space<vmem>>, vector<8x128xf32>
      tpu.vector_store %arg8[%c0_26, %c0_27], %28 {strides = array<i32>} : memref<8x128xf32, #tpu.memory_space<vmem>>, vector<8x128xf32>,
    } else {
    }
    return
  }
  func.func @transform_0(%arg0: i32, %arg1: i32) -> (i32, i32, i32) {
    %c0_i32 = arith.constant 0 : i32
    %c0_i32_0 = arith.constant 0 : i32
    return %arg0, %c0_i32, %arg1 : i32, i32, i32
  }
  func.func @transform_1(%arg0: i32, %arg1: i32) -> (i32, i32) {
    %c0_i32 = arith.constant 0 : i32
    %c0_i32_0 = arith.constant 0 : i32
    %c0_i32_1 = arith.constant 0 : i32
    return %c0_i32, %c0_i32_0 : i32, i32
  }
  func.func @transform_2(%arg0: i32, %arg1: i32) -> (i32, i32) {
    %c0_i32 = arith.constant 0 : i32
    %c0_i32_0 = arith.constant 0 : i32
    %c0_i32_1 = arith.constant 0 : i32
    return %c0_i32, %c0_i32_0 : i32, i32
  }
  func.func @transform_3(%arg0: i32, %arg1: i32) -> (i32, i32) {
    %c0_i32 = arith.constant 0 : i32
    %c0_i32_0 = arith.constant 0 : i32
    %c0_i32_1 = arith.constant 0 : i32
    return %c0_i32, %c0_i32_0 : i32, i32
  }
  func.func @transform_4(%arg0: i32, %arg1: i32) -> (i32, i32) {
    %c0_i32 = arith.constant 0 : i32
    %c0_i32_0 = arith.constant 0 : i32
    %c0_i32_1 = arith.constant 0 : i32
    return %c0_i32, %c0_i32_0 : i32, i32
  }
  func.func @transform_5(%arg0: i32, %arg1: i32) -> (i32, i32) {
    %c0_i32 = arith.constant 0 : i32
    %c0_i32_0 = arith.constant 0 : i32
    %c0_i32_1 = arith.constant 0 : i32
    return %c0_i32, %c0_i32_0 : i32, i32
  }
  func.func @transform_6(%arg0: i32, %arg1: i32) -> (i32, i32) {
    %c0_i32 = arith.constant 0 : i32
    %c0_i32_0 = arith.constant 0 : i32
    return %arg0, %c0_i32 : i32, i32
  }
  func.func @transform_7(%arg0: i32, %arg1: i32) -> (i32, i32) {
    %c0_i32 = arith.constant 0 : i32
    %c0_i32_0 = arith.constant 0 : i32
    return %arg0, %c0_i32 : i32, i32
  }
}

module attributes {stable_mosaic.version = 11 : i64} {
  func.func @_lfcbm_kernel(%arg0: i32, %arg1: i32, %arg2: memref<8x4x128xf32, #tpu.memory_space<vmem>>, %arg3: memref<4x128xbf16, #tpu.memory_space<vmem>>, %arg4: memref<1x128xf32, #tpu.memory_space<vmem>>, %arg5: memref<1x128xf32, #tpu.memory_space<vmem>>, %arg6: memref<128x128xbf16, #tpu.memory_space<vmem>>, %arg7: memref<1x128xf32, #tpu.memory_space<vmem>>, %arg8: memref<8x128xf32, #tpu.memory_space<vmem>>, %arg9: memref<8x128xf32, #tpu.memory_space<vmem>>, %arg10: memref<8x4xf32, #tpu.memory_space<vmem>>) attributes {dimension_semantics = [#tpu.dimension_semantics<parallel>, #tpu.dimension_semantics<arbitrary>], iteration_bounds = array<i64: 1, 2>, scalar_prefetch = 0 : i64, scratch_operands = 1 : i64, tpu.core_type = #tpu.core_type<tc>, window_params = [{transform_indices = @transform_0, window_bounds = array<i64: 8, 4, 128>}, {pipeline_mode = #tpu.pipeline_mode<synchronous>, transform_indices = @transform_1, window_bounds = array<i64: 4, 128>}, {pipeline_mode = #tpu.pipeline_mode<synchronous>, transform_indices = @transform_2, window_bounds = array<i64: 1, 128>}, {pipeline_mode = #tpu.pipeline_mode<synchronous>, transform_indices = @transform_3, window_bounds = array<i64: 1, 128>}, {pipeline_mode = #tpu.pipeline_mode<synchronous>, transform_indices = @transform_4, window_bounds = array<i64: 128, 128>}, {pipeline_mode = #tpu.pipeline_mode<synchronous>, transform_indices = @transform_5, window_bounds = array<i64: 1, 128>}, {transform_indices = @transform_6, window_bounds = array<i64: 8, 128>}, {transform_indices = @transform_7, window_bounds = array<i64: 8, 128>}]} {
    %c0_i32 = arith.constant 0 : i32
    %0 = arith.cmpi eq, %arg1, %c0_i32 : i32
    %1 = arith.extui %0 : i1 to i32
    %c0_i32_0 = arith.constant 0 : i32
    %2 = arith.cmpi ne, %1, %c0_i32_0 : i32
    scf.if %2 {
      %cst_8 = arith.constant 0.000000e+00 : f32
      %11 = vector.broadcast %cst_8 : f32 to vector<8x4xf32>
      %c0_9 = arith.constant 0 : index
      %c0_10 = arith.constant 0 : index
      %12 = vector.load %arg10[%c0_9, %c0_10] : memref<8x4xf32, #tpu.memory_space<vmem>>, vector<8x4xf32>
      tpu.vector_store %arg10[%c0_9, %c0_10], %11 {strides = array<i32>} : memref<8x4xf32, #tpu.memory_space<vmem>>, vector<8x4xf32>,
    } else {
    }
    %c0 = arith.constant 0 : index
    %c0_1 = arith.constant 0 : index
    %c0_2 = arith.constant 0 : index
    %3 = vector.load %arg2[%c0, %c0_1, %c0_2] : memref<8x4x128xf32, #tpu.memory_space<vmem>>, vector<8x4x128xf32>
    %c0_3 = arith.constant 0 : index
    %c0_4 = arith.constant 0 : index
    %4 = vector.load %arg10[%c0_3, %c0_4] : memref<8x4xf32, #tpu.memory_space<vmem>>, vector<8x4xf32>
    %cst = arith.constant dense<0.000000e+00> : vector<8x4xf32>
    %5 = vector.multi_reduction <add>, %3, %cst [2] : vector<8x4x128xf32> to vector<8x4xf32>
    %6 = arith.addf %4, %5 : vector<8x4xf32>
    %c0_5 = arith.constant 0 : index
    %c0_6 = arith.constant 0 : index
    %7 = vector.load %arg10[%c0_5, %c0_6] : memref<8x4xf32, #tpu.memory_space<vmem>>, vector<8x4xf32>
    tpu.vector_store %arg10[%c0_5, %c0_6], %6 {strides = array<i32>} : memref<8x4xf32, #tpu.memory_space<vmem>>, vector<8x4xf32>,
    %c1_i32 = arith.constant 1 : i32
    %8 = arith.cmpi eq, %arg1, %c1_i32 : i32
    %9 = arith.extui %8 : i1 to i32
    %c0_i32_7 = arith.constant 0 : i32
    %10 = arith.cmpi ne, %9, %c0_i32_7 : i32
    scf.if %10 {
      %c0_8 = arith.constant 0 : index
      %c0_9 = arith.constant 0 : index
      %11 = vector.load %arg10[%c0_8, %c0_9] : memref<8x4xf32, #tpu.memory_space<vmem>>, vector<8x4xf32>
      %12 = arith.truncf %11 : vector<8x4xf32> to vector<8x4xbf16>
      %c0_10 = arith.constant 0 : index
      %c0_11 = arith.constant 0 : index
      %13 = vector.load %arg3[%c0_10, %c0_11] : memref<4x128xbf16, #tpu.memory_space<vmem>>, vector<4x128xbf16>
      %cst_12 = arith.constant dense<0.000000e+00> : vector<8x128xf32>
      %14 = tpu.matmul %12, %13, %cst_12 {dimension_numbers = #tpu.dot_dimension_numbers<[1], [0], [0], [1], [0, 0, 1, 1], [], []>} : vector<8x4xbf16>, vector<4x128xbf16>, vector<8x128xf32> -> vector<8x128xf32>
      %c0_13 = arith.constant 0 : index
      %c0_14 = arith.constant 0 : index
      %15 = vector.load %arg4[%c0_13, %c0_14] : memref<1x128xf32, #tpu.memory_space<vmem>>, vector<1x128xf32>
      %16 = vector.broadcast %15 : vector<1x128xf32> to vector<8x128xf32>
      %17 = arith.subf %14, %16 : vector<8x128xf32>
      %c0_15 = arith.constant 0 : index
      %c0_16 = arith.constant 0 : index
      %18 = vector.load %arg5[%c0_15, %c0_16] : memref<1x128xf32, #tpu.memory_space<vmem>>, vector<1x128xf32>
      %19 = vector.broadcast %18 : vector<1x128xf32> to vector<8x128xf32>
      %20 = arith.mulf %17, %19 : vector<8x128xf32>
      %c0_17 = arith.constant 0 : index
      %c0_18 = arith.constant 0 : index
      %21 = vector.load %arg9[%c0_17, %c0_18] : memref<8x128xf32, #tpu.memory_space<vmem>>, vector<8x128xf32>
      tpu.vector_store %arg9[%c0_17, %c0_18], %20 {strides = array<i32>} : memref<8x128xf32, #tpu.memory_space<vmem>>, vector<8x128xf32>,
      %c0_19 = arith.constant 0 : index
      %c0_20 = arith.constant 0 : index
      %22 = vector.load %arg9[%c0_19, %c0_20] : memref<8x128xf32, #tpu.memory_space<vmem>>, vector<8x128xf32>
      %23 = arith.truncf %22 : vector<8x128xf32> to vector<8x128xbf16>
      %c0_21 = arith.constant 0 : index
      %c0_22 = arith.constant 0 : index
      %24 = vector.load %arg6[%c0_21, %c0_22] : memref<128x128xbf16, #tpu.memory_space<vmem>>, vector<128x128xbf16>
      %cst_23 = arith.constant dense<0.000000e+00> : vector<8x128xf32>
      %25 = tpu.matmul %23, %24, %cst_23 {dimension_numbers = #tpu.dot_dimension_numbers<[1], [0], [0], [1], [0, 0, 1, 1], [], []>} : vector<8x128xbf16>, vector<128x128xbf16>, vector<8x128xf32> -> vector<8x128xf32>
      %c0_24 = arith.constant 0 : index
      %c0_25 = arith.constant 0 : index
      %26 = vector.load %arg7[%c0_24, %c0_25] : memref<1x128xf32, #tpu.memory_space<vmem>>, vector<1x128xf32>
      %27 = vector.broadcast %26 : vector<1x128xf32> to vector<8x128xf32>
      %28 = arith.addf %25, %27 : vector<8x128xf32>
      %c0_26 = arith.constant 0 : index
      %c0_27 = arith.constant 0 : index
      %29 = vector.load %arg8[%c0_26, %c0_27] : memref<8x128xf32, #tpu.memory_space<vmem>>, vector<8x128xf32>
      tpu.vector_store %arg8[%c0_26, %c0_27], %28 {strides = array<i32>} : memref<8x128xf32, #tpu.memory_space<vmem>>, vector<8x128xf32>,
    } else {
    }
    return
  }
  func.func @transform_0(%arg0: i32, %arg1: i32) -> (i32, i32, i32) {
    %c0_i32 = arith.constant 0 : i32
    %c0_i32_0 = arith.constant 0 : i32
    return %arg0, %c0_i32, %arg1 : i32, i32, i32
  }
  func.func @transform_1(%arg0: i32, %arg1: i32) -> (i32, i32) {
    %c0_i32 = arith.constant 0 : i32
    %c0_i32_0 = arith.constant 0 : i32
    %c0_i32_1 = arith.constant 0 : i32
    return %c0_i32, %c0_i32_0 : i32, i32
  }
  func.func @transform_2(%arg0: i32, %arg1: i32) -> (i32, i32) {
    %c0_i32 = arith.constant 0 : i32
    %c0_i32_0 = arith.constant 0 : i32
    %c0_i32_1 = arith.constant 0 : i32
    return %c0_i32, %c0_i32_0 : i32, i32
  }
  func.func @transform_3(%arg0: i32, %arg1: i32) -> (i32, i32) {
    %c0_i32 = arith.constant 0 : i32
    %c0_i32_0 = arith.constant 0 : i32
    %c0_i32_1 = arith.constant 0 : i32
    return %c0_i32, %c0_i32_0 : i32, i32
  }
  func.func @transform_4(%arg0: i32, %arg1: i32) -> (i32, i32) {
    %c0_i32 = arith.constant 0 : i32
    %c0_i32_0 = arith.constant 0 : i32
    %c0_i32_1 = arith.constant 0 : i32
    return %c0_i32, %c0_i32_0 : i32, i32
  }
  func.func @transform_5(%arg0: i32, %arg1: i32) -> (i32, i32) {
    %c0_i32 = arith.constant 0 : i32
    %c0_i32_0 = arith.constant 0 : i32
    %c0_i32_1 = arith.constant 0 : i32
    return %c0_i32, %c0_i32_0 : i32, i32
  }
  func.func @transform_6(%arg0: i32, %arg1: i32) -> (i32, i32) {
    %c0_i32 = arith.constant 0 : i32
    %c0_i32_0 = arith.constant 0 : i32
    return %arg0, %c0_i32 : i32, i32
  }
  func.func @transform_7(%arg0: i32, %arg1: i32) -> (i32, i32) {
    %c0_i32 = arith.constant 0 : i32
    %c0_i32_0 = arith.constant 0 : i32
    return %arg0, %c0_i32 : i32, i32
  }
}

</mosaic_0001>

<bundles_post_ra>
// kernel: tpu_custom_call.1
= control target key start
LH: loop header
LB: loop body
LE: loop exit
PB: predicated region body
PF: predicated region fallthrough
CT: control target
= control target key end

     0   :  { %13 = vsyncpa [#allocation4], 0  ;;  %s1315_s0 = inlined_call_operand.hbm [shape: f32[2,4,256], index: 0, kind: input, shape index: {}]   ;;  %s1316_s1 = inlined_call_operand.vmem [shape: bf16[4,128], index: 1, kind: input, shape index: {}]   ;;  %s1317_s2 = inlined_call_operand.vmem [shape: f32[1,128], index: 2, kind: input, shape index: {}]   ;;  %s1318_s3 = inlined_call_operand.vmem [shape: f32[1,128], index: 3, kind: input, shape index: {}]   ;;  %s1319_s4 = inlined_call_operand.hbm [shape: bf16[128,128], index: 4, kind: input, shape index: {}]   ;;  %s1320_s5 = inlined_call_operand.vmem [shape: f32[1,128], index: 5, kind: input, shape index: {}]   ;;  %s1321_s6 = inlined_call_operand.hbm [shape: f32[2,128], index: 6, kind: output, shape index: {0}]   ;;  %s1322_s7 = inlined_call_operand.hbm [shape: f32[2,128], index: 7, kind: output, shape index: {1}]  }
   0x1   :  { %15 = vsyncpa [#allocation4 + $0x1], 0 }
   0x2   :  { %16 = vsyncpa [#allocation7], 0 }
   0x3   :  { %17 = vsyncpa [#allocation5], 0 }
   0x4   :  { %18 = vsyncpa [#allocation10], 0  ;;  %s1116_s24 = smov 0   ;;  %s1118_s25 = smov 0  }
   0x5   :  { %s1120_s26 = smov 0   ;;  %s1122_s27 = smov 0  }
   0x6   :  { %s1124_s28 = smov 0   ;;  %s1126_s29 = smov 0  }
   0x7 LB: > { %s1145_s30 = sadd.s32 4294967295, %s1058_s29   ;;  %s33_s8 = sadd.s32 1, %s1054_s28  ;;  %s1058_s29 = sphi %s1126_s29, %s24_s29   ;;  %s1054_s28 = sphi %s1124_s28, %s1339_s28   ;;  %s1050_s27 = sphi %s1122_s27, %s1338_s27   ;;  %s1046_s26 = sphi %s1120_s26, %s1337_s26   ;;  %s1042_s25 = sphi %s1118_s25, %s1336_s25   ;;  %s1038_s24 = sphi %s1116_s24, %s1335_s24  }
   0x8   : > { %p34_p0 = scmp.ge.s32.totalorder %s33_s8, 2  ;;  %s45_s9 = sadd.s32 1, %s1046_s26 }
   0x9   : > { %p52_p1 = scmp.ne.s32.totalorder %s1046_s26, %s1042_s25  ;;  %p53_p2 = scmp.eq.s32.totalorder %s1058_s29, 0 }
   0xa   : > { %s1341_s8 = smov (%p34_p0, %s33_s8), 0  ;;  %p58_p4 = scmp.ne.s32.totalorder %s1042_s25, %s1038_s24 }
   0xb   : > { %p1154_p3 = por %p53_p2, %p52_p1  ;;  %s41_s11 = ssub.s32 %s1054_s28, %s1341_s8 }
   0xc   : > { %p1323_p5 = scmp.eq.s32.totalorder %s1145_s30, 0  ;;  %p43_p6 = scmp.eq.s32.totalorder %s41_s11, 0 }
   0xd   : > { %s1326_s10 = scalar_select %p1154_p3, 1, 0 }
   0xe   : > { %p747_p7 = scmp.ge.s32.totalorder %s1058_s29, 1  ;;  %p1165_p8 = por %p1323_p5, %p58_p4 }
   0xf   : > { %p226_p9 = scmp.lt.s32.totalorder %s1058_s29, 3  ;;  %s1060_s15 = smov [#allocation6]  }
  0x10   : > { %s1327_s12 = scalar_select %p1165_p8, 1, 0 }
  0x11   : > { %s1171_s13 = scalar_select %p43_p6, %s1046_s26, %s45_s9  }
  0x12   : > { %p1173_p10 = pnand %p747_p7, %p226_p9  ;;  %s247_s16 = sshll.u32 %s1060_s15, 4  ;;  %s248_s16 = int_to_ptr.vmem [resolvable:$true] %s247_s16 }
  0x13   : > { %s900_s20 = scalar_lea.hbm %s1319_s4, 1024 }
  0x14   : > { %s1328_s14 = scalar_select %p1173_p10, 1, 0 }
  0x15   : > { %p821_p11 = pneg %p1173_p10  ;;  %p901_p13 = scmp.ne.s32.totalorder %s1319_s4, %s900_s20 }
  0x16   : > { %p907_p4 = scmp.lt.u32.totalorder %s900_s20, %s1319_s4 }
  0x17   : > { %p1181_p12 = pnand %p821_p11, %p1323_p5 }
  0x19   : > { %p902_p0 = pneg %p1181_p12 }
  0x1b   : > { %p903_p1 = pnand %p902_p0, %p901_p13 }
  0x1d   : > { %p904_p2 = pneg %p903_p1 }
  0x1f   : > { %p909_p6 = pnand %p907_p4, %p904_p2 }
  0x21   : > { %912 = shalt.err (!%p909_p6)
}
  0x22   : > { %s913_s9 = scalar_lea.vmem %s248_s16, 1024  ;;  %p921_p5 = scmp.lt.s32.totalorder %s248_s16, %s248_s16 }
  0x23   : > { %p914_p7 = scmp.ne.s32.totalorder %s248_s16, %s913_s9  ;;  %p922_p8 = scmp.lt.s32.totalorder %s913_s9, %s913_s9 }
  0x25   : > { %p916_p9 = pnand %p914_p7, %p902_p0  ;;  %p923_p10 = por %p922_p8, %p921_p5 }
  0x27   : > { %p917_p11 = pneg %p916_p9 }
  0x29   : > { %p924_p3 = pnand %p923_p10, %p917_p11 }
  0x2b   : > { %927 = shalt.err (!%p924_p3)
}
  0x2c   : > { %s1061_s11 = smov 64   ;;  %s1062_s15 = smov 4  }
  0x2d   : > { %824 = dma.hbm_to_vmem [thread:$0]  (!%p1181_p12), %s1319_s4, 1024, %s248_s16, [#allocation7], %s1061_s11, %s1061_s11, %s1062_s15  }
  0x2e   : > { %p749_p13 = scmp.ge.s32.totalorder %s1058_s29, 2 }
  0x2f   : > { %p1330_p1 = scmp.ne.s32.totalorder (!%p749_p13), %s1326_s10, 0 }
  0x30   : > { %260 = sbr.rel (%p749_p13) target bundleno = 87 (0x57), region = 36 }
  0x37   : > { %263 = sbr.rel (!%p1330_p1) target bundleno = 87 (0x57), region = 40  ;;  %s264_s20 = sand.u32 (%p1330_p1), 1, %s1046_s26  }
  0x38   : > { %s750_s21 = sshll.u32 (%p1330_p1), %s264_s20, 5  ;;  %s1205_s22 = scalar_lea.sflag (%p1330_p1), [#allocation4], %s264_s20 }
  0x39   : > { %s268_s23 = scalar_lea.vmem (%p1330_p1), [#allocation3], %s750_s21 }
  0x3e   : > { %274 = vsyncadd %s1205_s22, 384  ;;  %s751_s17 = sshll.u32 %s1054_s28, 6  ;;  %s281_s24 = sshll.u32 %s268_s23, 4  ;;  %s1214_s24 = int_to_ptr.vmem [resolvable:$true] %s281_s24 }
  0x3f   : > { %s1212_s16 = scalar_lea.hbm %s1315_s0, %s751_s17  ;;  %s930_s19 = scalar_lea.hbm %s1315_s0, 256 }
  0x40   : > { %s928_s10 = scalar_lea.hbm %s1212_s16, 128  ;;  %p931_p5 = scmp.lt.u32.totalorder %s1212_s16, %s1315_s0 }
  0x41   : > { %p929_p3 = scmp.ne.s32.totalorder %s1212_s16, %s928_s10  ;;  %p932_p8 = scmp.lt.u32.totalorder %s930_s19, %s928_s10 }
  0x42   : > { %p934_p12 = scmp.lt.u32.totalorder %s928_s10, %s1212_s16 }
  0x43   : > { %p933_p10 = por %p932_p8, %p931_p5 }
  0x45   : > { %p935_p0 = por %p934_p12, %p933_p10 }
  0x47   : > { %p936_p2 = pnand %p935_p0, %p929_p3 }
  0x49   : > { %939 = shalt.err (!%p936_p2)
}
  0x4a   : > { %s940_s23 = scalar_lea.vmem %s1214_s24, 128  ;;  %s1063_s17 = smov [#allocation3]  }
  0x4b   : > { %p941_p4 = scmp.ne.s32.totalorder %s1214_s24, %s940_s23  ;;  %s942_s9 = sshll.u32 %s1063_s17, 4  ;;  %s943_s9 = int_to_ptr.vmem [resolvable:$false] %s942_s9 }
  0x4c   : > { %s944_s18 = scalar_lea.vmem %s943_s9, 1024  ;;  %p945_p6 = scmp.lt.s32.totalorder %s1214_s24, %s943_s9 }
  0x4d   : > { %p946_p7 = scmp.lt.s32.totalorder %s944_s18, %s940_s23 }
  0x4f   : > { %p947_p9 = por %p946_p7, %p945_p6 }
  0x51   : > { %p948_p11 = pnand %p947_p9, %p941_p4 }
  0x53   : > { %951 = shalt.err (!%p948_p11)
}
  0x54   : > { %s1064_s11 = smov 128   ;;  %s1065_s10 = smov 64  }
  0x55   : > { %s1066_s15 = smov 4  }
  0x56   : > { %287 = dma.hbm_to_vmem [thread:$0]  %s1212_s16, 128, %s1214_s24, %s1205_s22, %s1064_s11, %s1065_s10, %s1066_s15  }
  0x57 PF: > { %p1331_p13 = scmp.ne.s32.totalorder %s1328_s14, 0 }
  0x58   : > { %s295_s19 = sand.u32 (!%p1331_p13), 1, %s1042_s25   ;;  %p1332_p1 = scmp.ne.s32.totalorder (!%p1331_p13), %s1327_s12, 0 }
  0x59   : > { %293 = sbr.rel (%p1331_p13) target bundleno = 774 (0x306), region = 44  ;;  %s753_s20 = sshll.u32 (!%p1331_p13), %s295_s19, 5 }
  0x5a   : > { %s296_s21 = scalar_lea.sflag (!%p1331_p13), [#allocation4], %s295_s19  ;;  %s299_s23 = scalar_lea.vmem (!%p1331_p13), [#allocation3], %s753_s20 }
  0x60   : > { %1021 = dma.done.wait (%p1332_p1), %s296_s21, 512  }
  0x61   : > { %1023 = vsyncadd (%p1332_p1), %s296_s21, 4294966784  ;;  %p1333_p3 = scmp.eq.s32.totalorder %s1145_s30, 0 }
  0x63   : > { %1025 = dma.done.wait (%p1333_p3), [#allocation7], 1024   ;;  %p1334_p5 = pmov %p1333_p3 }
  0x64   : > { %p755_p8 = scmp.ne.s32.totalorder %s1050_s27, 0 }
  0x65   : > { %1027 = vsyncadd (%p1334_p5), [#allocation7], 4294966272  ;;  %vm343_vm0 = vcmask (!%p755_p8), 31744   ;;  %v1067_v0 = vmov (!%p755_p8), 0.0  }
  0x66   : > { %342 = sbr.rel (%p755_p8) target bundleno = 109 (0x6d), region = 56  ;;  %344 = vst.msk [vmem:[#allocation2] sm:$0xff] (!%p755_p8), %vm343_vm0, %v1067_v0 }
  0x6d PF: > { %v345_v1 = vld [vmem:[%s299_s23] sm:$0xf]  ;;  %vm354_vm1 = vcmask 1043456   ;;  %v347_v2 = vld [vmem:[%s299_s23 + $0x8] sm:$0xf]  ;;  %v387_v17 = vlaneseq  ;;  %vm421_vm2 = vcmask 1041409  }
  0x6e   : > { %v355_v3 = vsel %vm354_vm1, %v345_v1, 0.0  ;;  %v361_v4 = vsel %vm354_vm1, %v347_v2, 0.0  ;;  %v346_v5 = vld [vmem:[%s299_s23 + $0x4] sm:$0xf]  ;;  %v348_v6 = vld [vmem:[%s299_s23 + $0xc] sm:$0xf] }
  0x6f   : > { %356 = vadd.xlane.f32.xlu0 %v355_v3  ;;  %362 = vadd.xlane.f32.xlu1 %v361_v4  ;;  %v358_v7 = vsel %vm354_vm1, %v346_v5, 0.0  ;;  %v364_v8 = vsel %vm354_vm1, %v348_v6, 0.0  ;;  %v349_v9 = vld [vmem:[%s299_s23 + $0x10] sm:$0xf]  ;;  %v350_v10 = vld [vmem:[%s299_s23 + $0x14] sm:$0xf] }
  0x70   : > { %v367_v11 = vsel %vm354_vm1, %v349_v9, 0.0  ;;  %v370_v12 = vsel %vm354_vm1, %v350_v10, 0.0  ;;  %v351_v13 = vld [vmem:[%s299_s23 + $0x18] sm:$0xf]  ;;  %v352_v14 = vld [vmem:[%s299_s23 + $0x1c] sm:$0xf] }
  0x71   : > { %v373_v15 = vsel %vm354_vm1, %v351_v13, 0.0  ;;  %v376_v16 = vsel %vm354_vm1, %v352_v14, 0.0  ;;  %v388_v18 = vand.u32 127, %v387_v17  ;;  %v390_v19 = vshrl.u32 %v387_v17, 7  ;;  %v353_v42 = vld [vmem:[#allocation2] sm:$0xff]  ;;  %p756_p10 = scmp.ne.s32.totalorder %s1050_s27, 1 }
  0x72   : > { %vm423_vm3 = vcmask 1042434   ;;  %vm425_vm4 = vcmask 1043459   ;;  %vm427_vm5 = vcmask 1044484   ;;  %vm429_vm6 = vcmask 1045509   ;;  %v445_v46 = vld [vmem:[%s1316_s1] sm:$0x3] (!%p756_p10) }
  0x73   : > { %359 = vadd.xlane.f32.xlu0 %v358_v7  ;;  %365 = vadd.xlane.f32.xlu1 %v364_v8  ;;  %v391_v22 = vsub.s32 %v388_v18, %v390_v19  ;;  %vm431_vm7 = vcmask 1046534   ;;  %vm433_vm8 = vcmask 1047559   ;;  %vm437_vm9 = vcmask 31744   ;;  %v892_v51 = vld [vmem:[#allocation6] sm:$0xff] (!%p756_p10)   ;;  %v893_v52 = vld [vmem:[#allocation6 + $0x8] sm:$0xff] (!%p756_p10)   ;;  %v894_v53 = vld [vmem:[#allocation6 + $0x10] sm:$0xff] (!%p756_p10)  }
  0x74   : > { %vm449_vm10 = vcmask (!%p756_p10), 1041408   ;;  %v1068_v48 = vmov (!%p756_p10), 0.0   ;;  %vm1069_vm11 = vmmov (!%p756_p10), 0   ;;  %v895_v54 = vld [vmem:[#allocation6 + $0x18] sm:$0xff] (!%p756_p10)   ;;  %v896_v55 = vld [vmem:[#allocation6 + $0x20] sm:$0xff] (!%p756_p10)   ;;  %v897_v56 = vld [vmem:[#allocation6 + $0x28] sm:$0xff] (!%p756_p10)  }
  0x75   : > { %786 = vmatprep.subr.bf16.mxu0 (!%p756_p10), %v1068_v48  ;;  %v451_v49 = vsel (!%p756_p10), %vm449_vm10, %v445_v46, 0  ;;  %788 = vmatprep.mubr.msk.bf16.mxu0 (!%p756_p10), %vm1069_vm11, %v1068_v48  ;;  %v898_v57 = vld [vmem:[#allocation6 + $0x30] sm:$0xff] (!%p756_p10)   ;;  %v899_v58 = vld [vmem:[#allocation6 + $0x38] sm:$0xff] (!%p756_p10)  }
  0x76   : > { %787 = vmatpush3.bf16.msra.mxu0 (!%p756_p10), %v451_v49  ;;  %792 = vmatprep.subr.bf16.mxu1 (!%p756_p10), %v1068_v48  ;;  %v758_v59 = vld [vmem:[%s1317_s2] ss:$0 sm:$0xff] (!%p756_p10) }
  0x77   : > { %368 = vadd.xlane.f32.xlu0 %v367_v11  ;;  %371 = vadd.xlane.f32.xlu1 %v370_v12  ;;  %v759_v61 = vld [vmem:[%s1318_s3] ss:$0 sm:$0xff] (!%p756_p10) }
  0x78   : > { %793 = vmatpush3.bf16.msra.mxu1 (!%p756_p10), %v892_v51  ;;  %808 = vmatprep.mubr.msk.bf16.mxu1 (!%p756_p10), %vm1069_vm11, %v1068_v48  ;;  %v760_v4 = vld [vmem:[%s1320_s5] ss:$0 sm:$0xff] (!%p756_p10) }
  0x79   : > { %794 = vmatprep.subr.bf16.mxu1 (!%p756_p10), %v1068_v48 }
  0x7b   : > { %374 = vadd.xlane.f32.xlu0 %v373_v15  ;;  %377 = vadd.xlane.f32.xlu1 %v376_v16 }
  0x7c   : > { %795 = vmatpush3.bf16.msra.mxu1 (!%p756_p10), %v893_v52 }
  0x7d   : > { %796 = vmatprep.subr.bf16.mxu1 (!%p756_p10), %v1068_v48 }
  0x80   : > { %797 = vmatpush3.bf16.msra.mxu1 (!%p756_p10), %v894_v53 }
  0x81   : > { %798 = vmatprep.subr.bf16.mxu1 (!%p756_p10), %v1068_v48 }
  0x84   : > { %799 = vmatpush3.bf16.msra.mxu1 (!%p756_p10), %v895_v54 }
  0x85   : > { %800 = vmatprep.subr.bf16.mxu1 (!%p756_p10), %v1068_v48 }
  0x88   : > { %801 = vmatpush3.bf16.msra.mxu1 (!%p756_p10), %v896_v55 }
  0x89   : > { %802 = vmatprep.subr.bf16.mxu1 (!%p756_p10), %v1068_v48 }
  0x8c   : > { %803 = vmatpush3.bf16.msra.mxu1 (!%p756_p10), %v897_v56 }
  0x8d   : > { %804 = vmatprep.subr.bf16.mxu1 (!%p756_p10), %v1068_v48 }
  0x90   : > { %805 = vmatpush3.bf16.msra.mxu1 (!%p756_p10), %v898_v57 }
  0x91   : > { %806 = vmatprep.subr.bf16.mxu1 (!%p756_p10), %v1068_v48 }
  0x94   : > { %807 = vmatpush3.bf16.msra.mxu1 (!%p756_p10), %v899_v58 }
  0xfc   : > { %v357_v20 = vpop.xlane.xlu0 %356  ;;  %v363_v21 = vpop.xlane.xlu1 %362 }
  0xfd   : > { %v392_v25 = vrot.slane %v357_v20, %v391_v22  ;;  %v400_v28 = vrot.slane %v363_v21, %v391_v22 }
 0x100   : > { %v360_v23 = vpop.xlane.xlu0 %359  ;;  %v366_v24 = vpop.xlane.xlu1 %365 }
 0x101   : > { %v396_v26 = vrot.slane %v360_v23, %v391_v22  ;;  %v404_v27 = vrot.slane %v366_v24, %v391_v22 }
 0x103   : > { %v422_v29 = vsel %vm421_vm2, %v396_v26, %v392_v25 }
 0x104   : > { %v424_v30 = vsel %vm423_vm3, %v400_v28, %v422_v29  ;;  %v369_v31 = vpop.xlane.xlu0 %368  ;;  %v372_v32 = vpop.xlane.xlu1 %371 }
 0x105   : > { %v426_v33 = vsel %vm425_vm4, %v404_v27, %v424_v30  ;;  %v408_v34 = vrot.slane %v369_v31, %v391_v22  ;;  %v412_v35 = vrot.slane %v372_v32, %v391_v22 }
 0x107   : > { %v428_v36 = vsel %vm427_vm5, %v408_v34, %v426_v33 }
 0x108   : > { %v375_v37 = vpop.xlane.xlu0 %374  ;;  %v378_v38 = vpop.xlane.xlu1 %377  ;;  %v430_v41 = vsel %vm429_vm6, %v412_v35, %v428_v36 }
 0x109   : > { %v416_v39 = vrot.slane %v375_v37, %v391_v22  ;;  %v420_v40 = vrot.slane %v378_v38, %v391_v22  ;;  %442 = sbr.rel (%p756_p10) target bundleno = 714 (0x2ca), region = 60 }
 0x10b   : > { %v432_v43 = vsel %vm431_vm7, %v416_v39, %v430_v41 }
 0x10c   : > { %v434_v44 = vsel %vm433_vm8, %v420_v40, %v432_v43 }
 0x10d   : > { %v436_v45 = vadd.f32 %v434_v44, %v353_v42 }
 0x10f   : > { %438 = vst.msk [vmem:[#allocation2] sm:$0xff] %vm437_vm9, %v436_v45 }
 0x116   : > { %v443_v47 = vld [vmem:[#allocation2] sm:$0xff] }
 0x117   : > { %v444_v50 = vpack.c.bf16 %v443_v47, %v443_v47 }
 0x119   : > { %789 = vmatmul.mubr.msk.bf16.vlgmr.msra.gmra.mrb[0].mxu0 %vm437_vm9, %v444_v50 }
 0x1ec   : > { %v487_v60 = vpop.f32.mrb[0].mxu0 }
 0x1ed   : > { %v500_v62 = vsub.f32 %v487_v60, %v758_v59  ;;  %v790_v63 = vpop.f32.mrb[1].mxu0 }
 0x1ee   : > { %v490_v0 = vpop.f32.mrb[2].mxu0 }
 0x1ef   : > { %v508_v1 = vmul.f32 %v759_v61, %v500_v62  ;;  %v791_v2 = vpop.f32.mrb[3].mxu0 }
 0x1f1   : > { %509 = vst [vmem:[#allocation9] sm:$0xff] %v508_v1  ;;  %v511_v3 = vpack.c.bf16 %v508_v1, %v508_v1 }
 0x1f3   : > { %809 = vmatmul.mubr.bf16.vlgmr.msra.gmra.mrb[0].mxu1 %v511_v3 }
 0x2c6   : > { %v617_v5 = vpop.f32.mrb[0].mxu1 }
 0x2c7   : > { %v618_v6 = vadd.f32 %v760_v4, %v617_v5  ;;  %v810_v7 = vpop.f32.mrb[1].mxu1 }
 0x2c8   : > { %v620_v8 = vpop.f32.mrb[2].mxu1 }
 0x2c9   : > { %623 = vst [vmem:[#allocation8] sm:$0xff] %v618_v6  ;;  %v811_v9 = vpop.f32.mrb[3].mxu1 }
 0x2ca PF: > { %p769_p12 = scmp.ne.s32.totalorder %s1145_s30, 1 }
 0x2cc   : > { %626 = sbr.rel (%p769_p12) target bundleno = 742 (0x2e6), region = 64 }
 0x2d3   : > { %632 = vsyncadd [#allocation5], 96  ;;  %s1070_s18 = smov [#allocation8]  }
 0x2d4   : > { %s637_s11 = sshll.u32 %s1070_s18, 4  ;;  %s638_s11 = int_to_ptr.vmem [resolvable:$true] %s637_s11 }
 0x2d5   : > { %s952_s10 = scalar_lea.vmem %s638_s11, 32  ;;  %s956_s15 = scalar_lea.vmem %s638_s11, 128 }
 0x2d6   : > { %p953_p0 = scmp.ne.s32.totalorder %s638_s11, %s952_s10  ;;  %p957_p2 = scmp.lt.s32.totalorder %s638_s11, %s638_s11 }
 0x2d7   : > { %p958_p4 = scmp.lt.s32.totalorder %s956_s15, %s952_s10 }
 0x2d9   : > { %p959_p6 = por %p958_p4, %p957_p2 }
 0x2db   : > { %p960_p7 = pnand %p959_p6, %p953_p0 }
 0x2dd   : > { %963 = shalt.err (!%p960_p7)
}
 0x2de   : > { %s964_s21 = scalar_lea.hbm %s1321_s6, 32 }
 0x2df   : > { %p965_p9 = scmp.ne.s32.totalorder %s1321_s6, %s964_s21  ;;  %p968_p11 = scmp.lt.u32.totalorder %s964_s21, %s1321_s6 }
 0x2e1   : > { %p970_p13 = pnand %p968_p11, %p965_p9 }
 0x2e3   : > { %973 = shalt.err (!%p970_p13)
}
 0x2e4   : > { %s1071_s22 = smov 32   ;;  %s1072_s24 = smov 2  }
 0x2e5   : > { %643 = dma.vmem_to_hbm [thread:$0]  %s638_s11, 32, %s1321_s6, [#allocation5], %s1071_s22, %s1071_s22, %s1072_s24  }
 0x2e6 PF: > { %646 = sbr.rel (%p769_p12) target bundleno = 768 (0x300), region = 68 }
 0x2ed   : > { %652 = vsyncadd [#allocation10], 96  ;;  %s1073_s9 = smov [#allocation9]  }
 0x2ee   : > { %s657_s18 = sshll.u32 %s1073_s9, 4  ;;  %s658_s18 = int_to_ptr.vmem [resolvable:$true] %s657_s18 }
 0x2ef   : > { %s974_s10 = scalar_lea.vmem %s658_s18, 32  ;;  %s978_s15 = scalar_lea.vmem %s658_s18, 128 }
 0x2f0   : > { %p975_p1 = scmp.ne.s32.totalorder %s658_s18, %s974_s10  ;;  %p979_p3 = scmp.lt.s32.totalorder %s658_s18, %s658_s18 }
 0x2f1   : > { %p980_p5 = scmp.lt.s32.totalorder %s978_s15, %s974_s10 }
 0x2f3   : > { %p981_p8 = por %p980_p5, %p979_p3 }
 0x2f5   : > { %p982_p10 = pnand %p981_p8, %p975_p1 }
 0x2f7   : > { %985 = shalt.err (!%p982_p10)
}
 0x2f8   : > { %s986_s11 = scalar_lea.hbm %s1322_s7, 32 }
 0x2f9   : > { %p987_p12 = scmp.ne.s32.totalorder %s1322_s7, %s986_s11  ;;  %p990_p0 = scmp.lt.u32.totalorder %s986_s11, %s1322_s7 }
 0x2fb   : > { %p992_p2 = pnand %p990_p0, %p987_p12 }
 0x2fd   : > { %995 = shalt.err (!%p992_p2)
}
 0x2fe   : > { %s1074_s27 = smov 32   ;;  %s1075_s22 = smov 2  }
 0x2ff   : > { %663 = dma.vmem_to_hbm [thread:$0]  %s658_s18, 32, %s1322_s7, [#allocation10], %s1074_s27, %s1074_s27, %s1075_s22  }
 0x300 PF: > { %p827_p4 = scmp.eq.s32.totalorder %s1145_s30, 1 }
 0x302   : > { %1029 = dma.done.wait (%p827_p4), [#allocation5], 128  }
 0x303   : > { %1031 = vsyncadd (%p827_p4), [#allocation5], 4294967168 }
 0x304   : > { %1033 = dma.done.wait (%p827_p4), [#allocation10], 128  }
 0x305   : > { %1035 = vsyncadd (%p827_p4), [#allocation10], 4294967168 }
 0x306 PF: > { %s24_s29 = sadd.s32 1, %s1058_s29   ;;  %s1335_s24 = smov %s1042_s25 }
 0x307   : > { %p21_p6 = scmp.ge.s32.totalorder %s24_s29, 4   ;;  %s1336_s25 = smov %s1046_s26 }
 0x308   : > { %s1337_s26 = smov %s1171_s13  ;;  %s1338_s27 = smov %s1054_s28 }
 0x309   : > { %s1339_s28 = smov %s1341_s8  ;;  %23 = sbr.rel (!%p21_p6) target bundleno = 7 (0x7), region = 103 }
 0x310   :  { %677 = vsyncpa [#allocation4], 1 }
 0x311   :  { %679 = vsyncpa [#allocation4 + $0x1], 1 }
 0x312   :  { %680 = vsyncpa [#allocation7], 1 }
 0x313   :  { %681 = vsyncpa [#allocation5], 1 }
 0x314   :  { %683 = vsyncpa [#allocation5 + $0x1], 1 }
 0x315   :  { %684 = vsyncpa [#allocation10], 1 }

// kernel: tpu_custom_call.1
= control target key start
LH: loop header
LB: loop body
LE: loop exit
PB: predicated region body
PF: predicated region fallthrough
CT: control target
= control target key end

     0   :  { %13 = vsyncpa [#allocation4], 0  ;;  %s1315_s0 = inlined_call_operand.hbm [shape: f32[2,4,256], index: 0, kind: input, shape index: {}]   ;;  %s1316_s1 = inlined_call_operand.vmem [shape: bf16[4,128], index: 1, kind: input, shape index: {}]   ;;  %s1317_s2 = inlined_call_operand.vmem [shape: f32[1,128], index: 2, kind: input, shape index: {}]   ;;  %s1318_s3 = inlined_call_operand.vmem [shape: f32[1,128], index: 3, kind: input, shape index: {}]   ;;  %s1319_s4 = inlined_call_operand.hbm [shape: bf16[128,128], index: 4, kind: input, shape index: {}]   ;;  %s1320_s5 = inlined_call_operand.vmem [shape: f32[1,128], index: 5, kind: input, shape index: {}]   ;;  %s1321_s6 = inlined_call_operand.hbm [shape: f32[2,128], index: 6, kind: output, shape index: {0}]   ;;  %s1322_s7 = inlined_call_operand.hbm [shape: f32[2,128], index: 7, kind: output, shape index: {1}]  }
   0x1   :  { %15 = vsyncpa [#allocation4 + $0x1], 0 }
   0x2   :  { %16 = vsyncpa [#allocation7], 0 }
   0x3   :  { %17 = vsyncpa [#allocation5], 0 }
   0x4   :  { %18 = vsyncpa [#allocation10], 0  ;;  %s1116_s24 = smov 0   ;;  %s1118_s25 = smov 0  }
   0x5   :  { %s1120_s26 = smov 0   ;;  %s1122_s27 = smov 0  }
   0x6   :  { %s1124_s28 = smov 0   ;;  %s1126_s29 = smov 0  }
   0x7 LB: > { %s1145_s30 = sadd.s32 4294967295, %s1058_s29   ;;  %s33_s8 = sadd.s32 1, %s1054_s28  ;;  %s1058_s29 = sphi %s1126_s29, %s24_s29   ;;  %s1054_s28 = sphi %s1124_s28, %s1339_s28   ;;  %s1050_s27 = sphi %s1122_s27, %s1338_s27   ;;  %s1046_s26 = sphi %s1120_s26, %s1337_s26   ;;  %s1042_s25 = sphi %s1118_s25, %s1336_s25   ;;  %s1038_s24 = sphi %s1116_s24, %s1335_s24  }
   0x8   : > { %p34_p0 = scmp.ge.s32.totalorder %s33_s8, 2  ;;  %s45_s9 = sadd.s32 1, %s1046_s26 }
   0x9   : > { %p52_p1 = scmp.ne.s32.totalorder %s1046_s26, %s1042_s25  ;;  %p53_p2 = scmp.eq.s32.totalorder %s1058_s29, 0 }
   0xa   : > { %s1341_s8 = smov (%p34_p0, %s33_s8), 0  ;;  %p58_p4 = scmp.ne.s32.totalorder %s1042_s25, %s1038_s24 }
   0xb   : > { %p1154_p3 = por %p53_p2, %p52_p1  ;;  %s41_s11 = ssub.s32 %s1054_s28, %s1341_s8 }
   0xc   : > { %p1323_p5 = scmp.eq.s32.totalorder %s1145_s30, 0  ;;  %p43_p6 = scmp.eq.s32.totalorder %s41_s11, 0 }
   0xd   : > { %s1326_s10 = scalar_select %p1154_p3, 1, 0 }
   0xe   : > { %p747_p7 = scmp.ge.s32.totalorder %s1058_s29, 1  ;;  %p1165_p8 = por %p1323_p5, %p58_p4 }
   0xf   : > { %p226_p9 = scmp.lt.s32.totalorder %s1058_s29, 3  ;;  %s1060_s15 = smov [#allocation6]  }
  0x10   : > { %s1327_s12 = scalar_select %p1165_p8, 1, 0 }
  0x11   : > { %s1171_s13 = scalar_select %p43_p6, %s1046_s26, %s45_s9  }
  0x12   : > { %p1173_p10 = pnand %p747_p7, %p226_p9  ;;  %s247_s16 = sshll.u32 %s1060_s15, 4  ;;  %s248_s16 = int_to_ptr.vmem [resolvable:$true] %s247_s16 }
  0x13   : > { %s900_s20 = scalar_lea.hbm %s1319_s4, 1024 }
  0x14   : > { %s1328_s14 = scalar_select %p1173_p10, 1, 0 }
  0x15   : > { %p821_p11 = pneg %p1173_p10  ;;  %p901_p13 = scmp.ne.s32.totalorder %s1319_s4, %s900_s20 }
  0x16   : > { %p907_p4 = scmp.lt.u32.totalorder %s900_s20, %s1319_s4 }
  0x17   : > { %p1181_p12 = pnand %p821_p11, %p1323_p5 }
  0x19   : > { %p902_p0 = pneg %p1181_p12 }
  0x1b   : > { %p903_p1 = pnand %p902_p0, %p901_p13 }
  0x1d   : > { %p904_p2 = pneg %p903_p1 }
  0x1f   : > { %p909_p6 = pnand %p907_p4, %p904_p2 }
  0x21   : > { %912 = shalt.err (!%p909_p6)
}
  0x22   : > { %s913_s9 = scalar_lea.vmem %s248_s16, 1024  ;;  %p921_p5 = scmp.lt.s32.totalorder %s248_s16, %s248_s16 }
  0x23   : > { %p914_p7 = scmp.ne.s32.totalorder %s248_s16, %s913_s9  ;;  %p922_p8 = scmp.lt.s32.totalorder %s913_s9, %s913_s9 }
  0x25   : > { %p916_p9 = pnand %p914_p7, %p902_p0  ;;  %p923_p10 = por %p922_p8, %p921_p5 }
  0x27   : > { %p917_p11 = pneg %p916_p9 }
  0x29   : > { %p924_p3 = pnand %p923_p10, %p917_p11 }
  0x2b   : > { %927 = shalt.err (!%p924_p3)
}
  0x2c   : > { %s1061_s11 = smov 64   ;;  %s1062_s15 = smov 4  }
  0x2d   : > { %824 = dma.hbm_to_vmem [thread:$0]  (!%p1181_p12), %s1319_s4, 1024, %s248_s16, [#allocation7], %s1061_s11, %s1061_s11, %s1062_s15  }
  0x2e   : > { %p749_p13 = scmp.ge.s32.totalorder %s1058_s29, 2 }
  0x2f   : > { %p1330_p1 = scmp.ne.s32.totalorder (!%p749_p13), %s1326_s10, 0 }
  0x30   : > { %260 = sbr.rel (%p749_p13) target bundleno = 87 (0x57), region = 36 }
  0x37   : > { %263 = sbr.rel (!%p1330_p1) target bundleno = 87 (0x57), region = 40  ;;  %s264_s20 = sand.u32 (%p1330_p1), 1, %s1046_s26  }
  0x38   : > { %s750_s21 = sshll.u32 (%p1330_p1), %s264_s20, 5  ;;  %s1205_s22 = scalar_lea.sflag (%p1330_p1), [#allocation4], %s264_s20 }
  0x39   : > { %s268_s23 = scalar_lea.vmem (%p1330_p1), [#allocation3], %s750_s21 }
  0x3e   : > { %274 = vsyncadd %s1205_s22, 384  ;;  %s751_s17 = sshll.u32 %s1054_s28, 6  ;;  %s281_s24 = sshll.u32 %s268_s23, 4  ;;  %s1214_s24 = int_to_ptr.vmem [resolvable:$true] %s281_s24 }
  0x3f   : > { %s1212_s16 = scalar_lea.hbm %s1315_s0, %s751_s17  ;;  %s930_s19 = scalar_lea.hbm %s1315_s0, 256 }
  0x40   : > { %s928_s10 = scalar_lea.hbm %s1212_s16, 128  ;;  %p931_p5 = scmp.lt.u32.totalorder %s1212_s16, %s1315_s0 }
  0x41   : > { %p929_p3 = scmp.ne.s32.totalorder %s1212_s16, %s928_s10  ;;  %p932_p8 = scmp.lt.u32.totalorder %s930_s19, %s928_s10 }
  0x42   : > { %p934_p12 = scmp.lt.u32.totalorder %s928_s10, %s1212_s16 }
  0x43   : > { %p933_p10 = por %p932_p8, %p931_p5 }
  0x45   : > { %p935_p0 = por %p934_p12, %p933_p10 }
  0x47   : > { %p936_p2 = pnand %p935_p0, %p929_p3 }
  0x49   : > { %939 = shalt.err (!%p936_p2)
}
  0x4a   : > { %s940_s23 = scalar_lea.vmem %s1214_s24, 128  ;;  %s1063_s17 = smov [#allocation3]  }
  0x4b   : > { %p941_p4 = scmp.ne.s32.totalorder %s1214_s24, %s940_s23  ;;  %s942_s9 = sshll.u32 %s1063_s17, 4  ;;  %s943_s9 = int_to_ptr.vmem [resolvable:$false] %s942_s9 }
  0x4c   : > { %s944_s18 = scalar_lea.vmem %s943_s9, 1024  ;;  %p945_p6 = scmp.lt.s32.totalorder %s1214_s24, %s943_s9 }
  0x4d   : > { %p946_p7 = scmp.lt.s32.totalorder %s944_s18, %s940_s23 }
  0x4f   : > { %p947_p9 = por %p946_p7, %p945_p6 }
  0x51   : > { %p948_p11 = pnand %p947_p9, %p941_p4 }
  0x53   : > { %951 = shalt.err (!%p948_p11)
}
  0x54   : > { %s1064_s11 = smov 128   ;;  %s1065_s10 = smov 64  }
  0x55   : > { %s1066_s15 = smov 4  }
  0x56   : > { %287 = dma.hbm_to_vmem [thread:$0]  %s1212_s16, 128, %s1214_s24, %s1205_s22, %s1064_s11, %s1065_s10, %s1066_s15  }
  0x57 PF: > { %p1331_p13 = scmp.ne.s32.totalorder %s1328_s14, 0 }
  0x58   : > { %s295_s19 = sand.u32 (!%p1331_p13), 1, %s1042_s25   ;;  %p1332_p1 = scmp.ne.s32.totalorder (!%p1331_p13), %s1327_s12, 0 }
  0x59   : > { %293 = sbr.rel (%p1331_p13) target bundleno = 774 (0x306), region = 44  ;;  %s753_s20 = sshll.u32 (!%p1331_p13), %s295_s19, 5 }
  0x5a   : > { %s296_s21 = scalar_lea.sflag (!%p1331_p13), [#allocation4], %s295_s19  ;;  %s299_s23 = scalar_lea.vmem (!%p1331_p13), [#allocation3], %s753_s20 }
  0x60   : > { %1021 = dma.done.wait (%p1332_p1), %s296_s21, 512  }
  0x61   : > { %1023 = vsyncadd (%p1332_p1), %s296_s21, 4294966784  ;;  %p1333_p3 = scmp.eq.s32.totalorder %s1145_s30, 0 }
  0x63   : > { %1025 = dma.done.wait (%p1333_p3), [#allocation7], 1024   ;;  %p1334_p5 = pmov %p1333_p3 }
  0x64   : > { %p755_p8 = scmp.ne.s32.totalorder %s1050_s27, 0 }
  0x65   : > { %1027 = vsyncadd (%p1334_p5), [#allocation7], 4294966272  ;;  %vm343_vm0 = vcmask (!%p755_p8), 31744   ;;  %v1067_v0 = vmov (!%p755_p8), 0.0  }
  0x66   : > { %342 = sbr.rel (%p755_p8) target bundleno = 109 (0x6d), region = 56  ;;  %344 = vst.msk [vmem:[#allocation2] sm:$0xff] (!%p755_p8), %vm343_vm0, %v1067_v0 }
  0x6d PF: > { %v345_v1 = vld [vmem:[%s299_s23] sm:$0xf]  ;;  %vm354_vm1 = vcmask 1043456   ;;  %v347_v2 = vld [vmem:[%s299_s23 + $0x8] sm:$0xf]  ;;  %v387_v17 = vlaneseq  ;;  %vm421_vm2 = vcmask 1041409  }
  0x6e   : > { %v355_v3 = vsel %vm354_vm1, %v345_v1, 0.0  ;;  %v361_v4 = vsel %vm354_vm1, %v347_v2, 0.0  ;;  %v346_v5 = vld [vmem:[%s299_s23 + $0x4] sm:$0xf]  ;;  %v348_v6 = vld [vmem:[%s299_s23 + $0xc] sm:$0xf] }
  0x6f   : > { %356 = vadd.xlane.f32.xlu0 %v355_v3  ;;  %362 = vadd.xlane.f32.xlu1 %v361_v4  ;;  %v358_v7 = vsel %vm354_vm1, %v346_v5, 0.0  ;;  %v364_v8 = vsel %vm354_vm1, %v348_v6, 0.0  ;;  %v349_v9 = vld [vmem:[%s299_s23 + $0x10] sm:$0xf]  ;;  %v350_v10 = vld [vmem:[%s299_s23 + $0x14] sm:$0xf] }
  0x70   : > { %v367_v11 = vsel %vm354_vm1, %v349_v9, 0.0  ;;  %v370_v12 = vsel %vm354_vm1, %v350_v10, 0.0  ;;  %v351_v13 = vld [vmem:[%s299_s23 + $0x18] sm:$0xf]  ;;  %v352_v14 = vld [vmem:[%s299_s23 + $0x1c] sm:$0xf] }
  0x71   : > { %v373_v15 = vsel %vm354_vm1, %v351_v13, 0.0  ;;  %v376_v16 = vsel %vm354_vm1, %v352_v14, 0.0  ;;  %v388_v18 = vand.u32 127, %v387_v17  ;;  %v390_v19 = vshrl.u32 %v387_v17, 7  ;;  %v353_v42 = vld [vmem:[#allocation2] sm:$0xff]  ;;  %p756_p10 = scmp.ne.s32.totalorder %s1050_s27, 1 }
  0x72   : > { %vm423_vm3 = vcmask 1042434   ;;  %vm425_vm4 = vcmask 1043459   ;;  %vm427_vm5 = vcmask 1044484   ;;  %vm429_vm6 = vcmask 1045509   ;;  %v445_v46 = vld [vmem:[%s1316_s1] sm:$0x3] (!%p756_p10) }
  0x73   : > { %359 = vadd.xlane.f32.xlu0 %v358_v7  ;;  %365 = vadd.xlane.f32.xlu1 %v364_v8  ;;  %v391_v22 = vsub.s32 %v388_v18, %v390_v19  ;;  %vm431_vm7 = vcmask 1046534   ;;  %vm433_vm8 = vcmask 1047559   ;;  %vm437_vm9 = vcmask 31744   ;;  %v892_v51 = vld [vmem:[#allocation6] sm:$0xff] (!%p756_p10)   ;;  %v893_v52 = vld [vmem:[#allocation6 + $0x8] sm:$0xff] (!%p756_p10)   ;;  %v894_v53 = vld [vmem:[#allocation6 + $0x10] sm:$0xff] (!%p756_p10)  }
  0x74   : > { %vm449_vm10 = vcmask (!%p756_p10), 1041408   ;;  %v1068_v48 = vmov (!%p756_p10), 0.0   ;;  %vm1069_vm11 = vmmov (!%p756_p10), 0   ;;  %v895_v54 = vld [vmem:[#allocation6 + $0x18] sm:$0xff] (!%p756_p10)   ;;  %v896_v55 = vld [vmem:[#allocation6 + $0x20] sm:$0xff] (!%p756_p10)   ;;  %v897_v56 = vld [vmem:[#allocation6 + $0x28] sm:$0xff] (!%p756_p10)  }
  0x75   : > { %786 = vmatprep.subr.bf16.mxu0 (!%p756_p10), %v1068_v48  ;;  %v451_v49 = vsel (!%p756_p10), %vm449_vm10, %v445_v46, 0  ;;  %788 = vmatprep.mubr.msk.bf16.mxu0 (!%p756_p10), %vm1069_vm11, %v1068_v48  ;;  %v898_v57 = vld [vmem:[#allocation6 + $0x30] sm:$0xff] (!%p756_p10)   ;;  %v899_v58 = vld [vmem:[#allocation6 + $0x38] sm:$0xff] (!%p756_p10)  }
  0x76   : > { %787 = vmatpush3.bf16.msra.mxu0 (!%p756_p10), %v451_v49  ;;  %792 = vmatprep.subr.bf16.mxu1 (!%p756_p10), %v1068_v48  ;;  %v758_v59 = vld [vmem:[%s1317_s2] ss:$0 sm:$0xff] (!%p756_p10) }
  0x77   : > { %368 = vadd.xlane.f32.xlu0 %v367_v11  ;;  %371 = vadd.xlane.f32.xlu1 %v370_v12  ;;  %v759_v61 = vld [vmem:[%s1318_s3] ss:$0 sm:$0xff] (!%p756_p10) }
  0x78   : > { %793 = vmatpush3.bf16.msra.mxu1 (!%p756_p10), %v892_v51  ;;  %808 = vmatprep.mubr.msk.bf16.mxu1 (!%p756_p10), %vm1069_vm11, %v1068_v48  ;;  %v760_v4 = vld [vmem:[%s1320_s5] ss:$0 sm:$0xff] (!%p756_p10) }
  0x79   : > { %794 = vmatprep.subr.bf16.mxu1 (!%p756_p10), %v1068_v48 }
  0x7b   : > { %374 = vadd.xlane.f32.xlu0 %v373_v15  ;;  %377 = vadd.xlane.f32.xlu1 %v376_v16 }
  0x7c   : > { %795 = vmatpush3.bf16.msra.mxu1 (!%p756_p10), %v893_v52 }
  0x7d   : > { %796 = vmatprep.subr.bf16.mxu1 (!%p756_p10), %v1068_v48 }
  0x80   : > { %797 = vmatpush3.bf16.msra.mxu1 (!%p756_p10), %v894_v53 }
  0x81   : > { %798 = vmatprep.subr.bf16.mxu1 (!%p756_p10), %v1068_v48 }
  0x84   : > { %799 = vmatpush3.bf16.msra.mxu1 (!%p756_p10), %v895_v54 }
  0x85   : > { %800 = vmatprep.subr.bf16.mxu1 (!%p756_p10), %v1068_v48 }
  0x88   : > { %801 = vmatpush3.bf16.msra.mxu1 (!%p756_p10), %v896_v55 }
  0x89   : > { %802 = vmatprep.subr.bf16.mxu1 (!%p756_p10), %v1068_v48 }
  0x8c   : > { %803 = vmatpush3.bf16.msra.mxu1 (!%p756_p10), %v897_v56 }
  0x8d   : > { %804 = vmatprep.subr.bf16.mxu1 (!%p756_p10), %v1068_v48 }
  0x90   : > { %805 = vmatpush3.bf16.msra.mxu1 (!%p756_p10), %v898_v57 }
  0x91   : > { %806 = vmatprep.subr.bf16.mxu1 (!%p756_p10), %v1068_v48 }
  0x94   : > { %807 = vmatpush3.bf16.msra.mxu1 (!%p756_p10), %v899_v58 }
  0xfc   : > { %v357_v20 = vpop.xlane.xlu0 %356  ;;  %v363_v21 = vpop.xlane.xlu1 %362 }
  0xfd   : > { %v392_v25 = vrot.slane %v357_v20, %v391_v22  ;;  %v400_v28 = vrot.slane %v363_v21, %v391_v22 }
 0x100   : > { %v360_v23 = vpop.xlane.xlu0 %359  ;;  %v366_v24 = vpop.xlane.xlu1 %365 }
 0x101   : > { %v396_v26 = vrot.slane %v360_v23, %v391_v22  ;;  %v404_v27 = vrot.slane %v366_v24, %v391_v22 }
 0x103   : > { %v422_v29 = vsel %vm421_vm2, %v396_v26, %v392_v25 }
 0x104   : > { %v424_v30 = vsel %vm423_vm3, %v400_v28, %v422_v29  ;;  %v369_v31 = vpop.xlane.xlu0 %368  ;;  %v372_v32 = vpop.xlane.xlu1 %371 }
 0x105   : > { %v426_v33 = vsel %vm425_vm4, %v404_v27, %v424_v30  ;;  %v408_v34 = vrot.slane %v369_v31, %v391_v22  ;;  %v412_v35 = vrot.slane %v372_v32, %v391_v22 }
 0x107   : > { %v428_v36 = vsel %vm427_vm5, %v408_v34, %v426_v33 }
 0x108   : > { %v375_v37 = vpop.xlane.xlu0 %374  ;;  %v378_v38 = vpop.xlane.xlu1 %377  ;;  %v430_v41 = vsel %vm429_vm6, %v412_v35, %v428_v36 }
 0x109   : > { %v416_v39 = vrot.slane %v375_v37, %v391_v22  ;;  %v420_v40 = vrot.slane %v378_v38, %v391_v22  ;;  %442 = sbr.rel (%p756_p10) target bundleno = 714 (0x2ca), region = 60 }
 0x10b   : > { %v432_v43 = vsel %vm431_vm7, %v416_v39, %v430_v41 }
 0x10c   : > { %v434_v44 = vsel %vm433_vm8, %v420_v40, %v432_v43 }
 0x10d   : > { %v436_v45 = vadd.f32 %v434_v44, %v353_v42 }
 0x10f   : > { %438 = vst.msk [vmem:[#allocation2] sm:$0xff] %vm437_vm9, %v436_v45 }
 0x116   : > { %v443_v47 = vld [vmem:[#allocation2] sm:$0xff] }
 0x117   : > { %v444_v50 = vpack.c.bf16 %v443_v47, %v443_v47 }
 0x119   : > { %789 = vmatmul.mubr.msk.bf16.vlgmr.msra.gmra.mrb[0].mxu0 %vm437_vm9, %v444_v50 }
 0x1ec   : > { %v487_v60 = vpop.f32.mrb[0].mxu0 }
 0x1ed   : > { %v500_v62 = vsub.f32 %v487_v60, %v758_v59  ;;  %v790_v63 = vpop.f32.mrb[1].mxu0 }
 0x1ee   : > { %v490_v0 = vpop.f32.mrb[2].mxu0 }
 0x1ef   : > { %v508_v1 = vmul.f32 %v759_v61, %v500_v62  ;;  %v791_v2 = vpop.f32.mrb[3].mxu0 }
 0x1f1   : > { %509 = vst [vmem:[#allocation9] sm:$0xff] %v508_v1  ;;  %v511_v3 = vpack.c.bf16 %v508_v1, %v508_v1 }
 0x1f3   : > { %809 = vmatmul.mubr.bf16.vlgmr.msra.gmra.mrb[0].mxu1 %v511_v3 }
 0x2c6   : > { %v617_v5 = vpop.f32.mrb[0].mxu1 }
 0x2c7   : > { %v618_v6 = vadd.f32 %v760_v4, %v617_v5  ;;  %v810_v7 = vpop.f32.mrb[1].mxu1 }
 0x2c8   : > { %v620_v8 = vpop.f32.mrb[2].mxu1 }
 0x2c9   : > { %623 = vst [vmem:[#allocation8] sm:$0xff] %v618_v6  ;;  %v811_v9 = vpop.f32.mrb[3].mxu1 }
 0x2ca PF: > { %p769_p12 = scmp.ne.s32.totalorder %s1145_s30, 1 }
 0x2cc   : > { %626 = sbr.rel (%p769_p12) target bundleno = 742 (0x2e6), region = 64 }
 0x2d3   : > { %632 = vsyncadd [#allocation5], 96  ;;  %s1070_s18 = smov [#allocation8]  }
 0x2d4   : > { %s637_s11 = sshll.u32 %s1070_s18, 4  ;;  %s638_s11 = int_to_ptr.vmem [resolvable:$true] %s637_s11 }
 0x2d5   : > { %s952_s10 = scalar_lea.vmem %s638_s11, 32  ;;  %s956_s15 = scalar_lea.vmem %s638_s11, 128 }
 0x2d6   : > { %p953_p0 = scmp.ne.s32.totalorder %s638_s11, %s952_s10  ;;  %p957_p2 = scmp.lt.s32.totalorder %s638_s11, %s638_s11 }
 0x2d7   : > { %p958_p4 = scmp.lt.s32.totalorder %s956_s15, %s952_s10 }
 0x2d9   : > { %p959_p6 = por %p958_p4, %p957_p2 }
 0x2db   : > { %p960_p7 = pnand %p959_p6, %p953_p0 }
 0x2dd   : > { %963 = shalt.err (!%p960_p7)
}
 0x2de   : > { %s964_s21 = scalar_lea.hbm %s1321_s6, 32 }
 0x2df   : > { %p965_p9 = scmp.ne.s32.totalorder %s1321_s6, %s964_s21  ;;  %p968_p11 = scmp.lt.u32.totalorder %s964_s21, %s1321_s6 }
 0x2e1   : > { %p970_p13 = pnand %p968_p11, %p965_p9 }
 0x2e3   : > { %973 = shalt.err (!%p970_p13)
}
 0x2e4   : > { %s1071_s22 = smov 32   ;;  %s1072_s24 = smov 2  }
 0x2e5   : > { %643 = dma.vmem_to_hbm [thread:$0]  %s638_s11, 32, %s1321_s6, [#allocation5], %s1071_s22, %s1071_s22, %s1072_s24  }
 0x2e6 PF: > { %646 = sbr.rel (%p769_p12) target bundleno = 768 (0x300), region = 68 }
 0x2ed   : > { %652 = vsyncadd [#allocation10], 96  ;;  %s1073_s9 = smov [#allocation9]  }
 0x2ee   : > { %s657_s18 = sshll.u32 %s1073_s9, 4  ;;  %s658_s18 = int_to_ptr.vmem [resolvable:$true] %s657_s18 }
 0x2ef   : > { %s974_s10 = scalar_lea.vmem %s658_s18, 32  ;;  %s978_s15 = scalar_lea.vmem %s658_s18, 128 }
 0x2f0   : > { %p975_p1 = scmp.ne.s32.totalorder %s658_s18, %s974_s10  ;;  %p979_p3 = scmp.lt.s32.totalorder %s658_s18, %s658_s18 }
 0x2f1   : > { %p980_p5 = scmp.lt.s32.totalorder %s978_s15, %s974_s10 }
 0x2f3   : > { %p981_p8 = por %p980_p5, %p979_p3 }
 0x2f5   : > { %p982_p10 = pnand %p981_p8, %p975_p1 }
 0x2f7   : > { %985 = shalt.err (!%p982_p10)
}
 0x2f8   : > { %s986_s11 = scalar_lea.hbm %s1322_s7, 32 }
 0x2f9   : > { %p987_p12 = scmp.ne.s32.totalorder %s1322_s7, %s986_s11  ;;  %p990_p0 = scmp.lt.u32.totalorder %s986_s11, %s1322_s7 }
 0x2fb   : > { %p992_p2 = pnand %p990_p0, %p987_p12 }
 0x2fd   : > { %995 = shalt.err (!%p992_p2)
}
 0x2fe   : > { %s1074_s27 = smov 32   ;;  %s1075_s22 = smov 2  }
 0x2ff   : > { %663 = dma.vmem_to_hbm [thread:$0]  %s658_s18, 32, %s1322_s7, [#allocation10], %s1074_s27, %s1074_s27, %s1075_s22  }
 0x300 PF: > { %p827_p4 = scmp.eq.s32.totalorder %s1145_s30, 1 }
 0x302   : > { %1029 = dma.done.wait (%p827_p4), [#allocation5], 128  }
 0x303   : > { %1031 = vsyncadd (%p827_p4), [#allocation5], 4294967168 }
 0x304   : > { %1033 = dma.done.wait (%p827_p4), [#allocation10], 128  }
 0x305   : > { %1035 = vsyncadd (%p827_p4), [#allocation10], 4294967168 }
 0x306 PF: > { %s24_s29 = sadd.s32 1, %s1058_s29   ;;  %s1335_s24 = smov %s1042_s25 }
 0x307   : > { %p21_p6 = scmp.ge.s32.totalorder %s24_s29, 4   ;;  %s1336_s25 = smov %s1046_s26 }
 0x308   : > { %s1337_s26 = smov %s1171_s13  ;;  %s1338_s27 = smov %s1054_s28 }
 0x309   : > { %s1339_s28 = smov %s1341_s8  ;;  %23 = sbr.rel (!%p21_p6) target bundleno = 7 (0x7), region = 103 }
 0x310   :  { %677 = vsyncpa [#allocation4], 1 }
 0x311   :  { %679 = vsyncpa [#allocation4 + $0x1], 1 }
 0x312   :  { %680 = vsyncpa [#allocation7], 1 }
 0x313   :  { %681 = vsyncpa [#allocation5], 1 }
 0x314   :  { %683 = vsyncpa [#allocation5 + $0x1], 1 }
 0x315   :  { %684 = vsyncpa [#allocation10], 1 }

</bundles_post_ra>
